<compile_context>
chip_gen: v5e
topology: v5e:2x2
jax: 0.10.0
libtpu: 0.0.40
codegen_flags: <defaults>
</compile_context>

<pallas_src>
import jax
import jax.numpy as jnp
from jax.experimental import pallas as pl
from jax.experimental.pallas import tpu as pltpu


def _dma_copy_kernel_single(src_ref, dst_ref, sem):
    # One whole-array HBM->HBM DMA.  No VMEM staging, no vector load/store.
    cp = pltpu.make_async_copy(src_ref, dst_ref, sem)
    cp.start()
    cp.wait()


def _make_dma_copy_kernel_split(split, total):
    rest = total - split

    def kernel(src_ref, dst_ref, sems):
        # Two chunked HBM->HBM DMAs kept in flight simultaneously (two DMA
        # semaphores), then both waited on.  Keeps the DMA engines busier than
        # a single descriptor for large arrays; still zero TensorCore work.
        cp0 = pltpu.make_async_copy(
            src_ref.at[pl.ds(0, split)], dst_ref.at[pl.ds(0, split)], sems.at[0])
        cp1 = pltpu.make_async_copy(
            src_ref.at[pl.ds(split, rest)], dst_ref.at[pl.ds(split, rest)], sems.at[1])
        cp0.start()
        cp1.start()
        cp0.wait()
        cp1.wait()

    return kernel


def _pallas_hbm_copy(x):
    """Materialize a distinct copy of `x` via direct HBM->HBM DMA (no VMEM)."""
    itemsize = jnp.dtype(x.dtype).itemsize
    nbytes = int(x.size) * itemsize
    cost = pl.CostEstimate(flops=0, transcendentals=0, bytes_accessed=2 * nbytes)

    n = x.shape[0] if x.ndim >= 1 else 1
    if x.ndim >= 1 and n >= 2:
        split = n // 2
        kernel = _make_dma_copy_kernel_split(split, n)
        scratch = [pltpu.SemaphoreType.DMA((2,))]
    else:
        kernel = _dma_copy_kernel_single
        scratch = [pltpu.SemaphoreType.DMA(())]

    return pl.pallas_call(
        kernel,
        out_shape=jax.ShapeDtypeStruct(x.shape, x.dtype),
        in_specs=[pl.BlockSpec(memory_space=pl.ANY)],
        out_specs=pl.BlockSpec(memory_space=pl.ANY),
        scratch_shapes=scratch,
        cost_estimate=cost,
    )(x)


def passthrough_forward(waveforms, max_channels=None, *, copy=False):
    """Pallas equivalent of Passthrough(pipeline=None).forward.

    Returns (waveforms, {}) matching the PyTorch module's output structure.

    copy=False (default): return the input array itself (aliased), exactly like
        the PyTorch module — zero HBM traffic.
    copy=True: materialize a distinct buffer via a direct HBM->HBM DMA Pallas
        kernel (only useful if the caller requires a separate allocation).
    """
    if not copy:
        return waveforms, {}
    out = _pallas_hbm_copy(waveforms)
    return out, {}


if __name__ == "__main__":
    key = jax.random.PRNGKey(0)
    # Small waveform batch: 16 spikes, 16 time samples, 128 channels (N, T, C).
    n_spikes, n_times, n_chans = 16, 16, 128
    waveforms = jax.random.normal(
        key, (n_spikes, n_times, n_chans), dtype=jnp.float32)

    # --- Fast path: true passthrough (aliased, matches PyTorch semantics). ---
    out_fast, feats_fast = passthrough_forward(waveforms)
    assert out_fast is waveforms
    assert feats_fast == {}

    # --- Copy path: exercises the two-chunk HBM->HBM DMA kernel. ------------
    out_copy, feats_copy = passthrough_forward(waveforms, copy=True)
    out_copy = jax.block_until_ready(out_copy)
    assert feats_copy == {}
    assert out_copy.shape == waveforms.shape
    assert out_copy.dtype == waveforms.dtype
    assert bool(jnp.array_equal(out_copy, waveforms))

    # --- Odd spike count + bf16: DMA path is dtype/shape agnostic. ----------
    key2 = jax.random.PRNGKey(0)
    ragged = jax.random.normal(
        key2, (7, n_times, n_chans), dtype=jnp.float32).astype(jnp.bfloat16)
    out_ragged, _ = passthrough_forward(ragged, copy=True)
    out_ragged = jax.block_until_ready(out_ragged)
    assert out_ragged.dtype == jnp.bfloat16
    assert bool(jnp.array_equal(out_ragged, ragged))

    # --- Single-spike batch: single whole-array DMA path. -------------------
    one = jax.random.normal(
        jax.random.PRNGKey(0), (1, n_times, n_chans), dtype=jnp.float32)
    out_one, _ = passthrough_forward(one, copy=True)
    out_one = jax.block_until_ready(out_one)
    assert bool(jnp.array_equal(out_one, one))

    print("KERNEL_OK")
</pallas_src>

<mosaic_0001>
module attributes {stable_mosaic.version = 11 : i64} {
  func.func @kernel(%arg0: memref<16x16x128xf32, #tpu.memory_space<any>>, %arg1: memref<16x16x128xf32, #tpu.memory_space<any>>, %arg2: memref<2x!tpu.dma_semaphore, #tpu.memory_space<semaphore_mem>>) attributes {dimension_semantics = [], scalar_prefetch = 0 : i64, scratch_operands = 1 : i64, tpu.core_type = #tpu.core_type<tc>} {
    %c0_i32 = arith.constant 0 : i32
    %c0_i32_0 = arith.constant 0 : i32
    %c0_i32_1 = arith.constant 0 : i32
    %c0_i32_2 = arith.constant 0 : i32
    %0 = tpu.memref_slice %arg0[%c0_i32_0, %c0_i32_1, %c0_i32_2] : memref<16x16x128xf32, #tpu.memory_space<any>> -> memref<8x16x128xf32, #tpu.memory_space<any>>
    %c0_i32_3 = arith.constant 0 : i32
    %c0_i32_4 = arith.constant 0 : i32
    %c0_i32_5 = arith.constant 0 : i32
    %1 = tpu.memref_slice %arg1[%c0_i32_3, %c0_i32_4, %c0_i32_5] : memref<16x16x128xf32, #tpu.memory_space<any>> -> memref<8x16x128xf32, #tpu.memory_space<any>>
    %2 = tpu.memref_slice %arg2[%c0_i32] : memref<2x!tpu.dma_semaphore, #tpu.memory_space<semaphore_mem>> -> memref<1x!tpu.dma_semaphore, #tpu.memory_space<semaphore_mem>>
    %3 = tpu.memref_squeeze %2 : memref<1x!tpu.dma_semaphore, #tpu.memory_space<semaphore_mem>> -> memref<!tpu.dma_semaphore, #tpu.memory_space<semaphore_mem>>
    tpu.enqueue_dma source(%0 : memref<8x16x128xf32, #tpu.memory_space<any>>) target(%1 : memref<8x16x128xf32, #tpu.memory_space<any>>) target_semaphore(%3 : memref<!tpu.dma_semaphore, #tpu.memory_space<semaphore_mem>>)
    %c1_i32 = arith.constant 1 : i32
    %c8_i32 = arith.constant 8 : i32
    %c0_i32_6 = arith.constant 0 : i32
    %c0_i32_7 = arith.constant 0 : i32
    %4 = tpu.memref_slice %arg0[%c8_i32, %c0_i32_6, %c0_i32_7] : memref<16x16x128xf32, #tpu.memory_space<any>> -> memref<8x16x128xf32, #tpu.memory_space<any>>
    %c8_i32_8 = arith.constant 8 : i32
    %c0_i32_9 = arith.constant 0 : i32
    %c0_i32_10 = arith.constant 0 : i32
    %5 = tpu.memref_slice %arg1[%c8_i32_8, %c0_i32_9, %c0_i32_10] : memref<16x16x128xf32, #tpu.memory_space<any>> -> memref<8x16x128xf32, #tpu.memory_space<any>>
    %6 = tpu.memref_slice %arg2[%c1_i32] : memref<2x!tpu.dma_semaphore, #tpu.memory_space<semaphore_mem>> -> memref<1x!tpu.dma_semaphore, #tpu.memory_space<semaphore_mem>>
    %7 = tpu.memref_squeeze %6 : memref<1x!tpu.dma_semaphore, #tpu.memory_space<semaphore_mem>> -> memref<!tpu.dma_semaphore, #tpu.memory_space<semaphore_mem>>
    tpu.enqueue_dma source(%4 : memref<8x16x128xf32, #tpu.memory_space<any>>) target(%5 : memref<8x16x128xf32, #tpu.memory_space<any>>) target_semaphore(%7 : memref<!tpu.dma_semaphore, #tpu.memory_space<semaphore_mem>>)
    %c0_i32_11 = arith.constant 0 : i32
    %c0_i32_12 = arith.constant 0 : i32
    %c0_i32_13 = arith.constant 0 : i32
    %c0_i32_14 = arith.constant 0 : i32
    %8 = tpu.memref_slice %arg0[%c0_i32_12, %c0_i32_13, %c0_i32_14] : memref<16x16x128xf32, #tpu.memory_space<any>> -> memref<8x16x128xf32, #tpu.memory_space<any>>
    %c0_i32_15 = arith.constant 0 : i32
    %c0_i32_16 = arith.constant 0 : i32
    %c0_i32_17 = arith.constant 0 : i32
    %9 = tpu.memref_slice %arg1[%c0_i32_15, %c0_i32_16, %c0_i32_17] : memref<16x16x128xf32, #tpu.memory_space<any>> -> memref<8x16x128xf32, #tpu.memory_space<any>>
    %10 = tpu.memref_slice %arg2[%c0_i32_11] : memref<2x!tpu.dma_semaphore, #tpu.memory_space<semaphore_mem>> -> memref<1x!tpu.dma_semaphore, #tpu.memory_space<semaphore_mem>>
    %11 = tpu.memref_squeeze %10 : memref<1x!tpu.dma_semaphore, #tpu.memory_space<semaphore_mem>> -> memref<!tpu.dma_semaphore, #tpu.memory_space<semaphore_mem>>
    tpu.wait_dma2 semaphore(%11 : memref<!tpu.dma_semaphore, #tpu.memory_space<semaphore_mem>>) src(%8 : memref<8x16x128xf32, #tpu.memory_space<any>>) dst(%9 : memref<8x16x128xf32, #tpu.memory_space<any>>)
    %c1_i32_18 = arith.constant 1 : i32
    %c8_i32_19 = arith.constant 8 : i32
    %c0_i32_20 = arith.constant 0 : i32
    %c0_i32_21 = arith.constant 0 : i32
    %12 = tpu.memref_slice %arg0[%c8_i32_19, %c0_i32_20, %c0_i32_21] : memref<16x16x128xf32, #tpu.memory_space<any>> -> memref<8x16x128xf32, #tpu.memory_space<any>>
    %c8_i32_22 = arith.constant 8 : i32
    %c0_i32_23 = arith.constant 0 : i32
    %c0_i32_24 = arith.constant 0 : i32
    %13 = tpu.memref_slice %arg1[%c8_i32_22, %c0_i32_23, %c0_i32_24] : memref<16x16x128xf32, #tpu.memory_space<any>> -> memref<8x16x128xf32, #tpu.memory_space<any>>
    %14 = tpu.memref_slice %arg2[%c1_i32_18] : memref<2x!tpu.dma_semaphore, #tpu.memory_space<semaphore_mem>> -> memref<1x!tpu.dma_semaphore, #tpu.memory_space<semaphore_mem>>
    %15 = tpu.memref_squeeze %14 : memref<1x!tpu.dma_semaphore, #tpu.memory_space<semaphore_mem>> -> memref<!tpu.dma_semaphore, #tpu.memory_space<semaphore_mem>>
    tpu.wait_dma2 semaphore(%15 : memref<!tpu.dma_semaphore, #tpu.memory_space<semaphore_mem>>) src(%12 : memref<8x16x128xf32, #tpu.memory_space<any>>) dst(%13 : memref<8x16x128xf32, #tpu.memory_space<any>>)
    return
  }
}

</mosaic_0001>

<bundles_post_ra>
// kernel: tpu_custom_call.1
= control target key start
LH: loop header
LB: loop body
LE: loop exit
PB: predicated region body
PF: predicated region fallthrough
CT: control target
= control target key end

     0   :  { %s61_s15 = smov [#allocation2]   ;;  %s62_s16 = smov [#allocation3]   ;;  %s88_s0 = inlined_call_operand.hbm [shape: f32[16,16,128], index: 0, kind: input, shape index: {}]   ;;  %s89_s1 = inlined_call_operand.hbm [shape: f32[16,16,128], index: 1, kind: output, shape index: {}]  }
   0x1   :  { %s10_s8 = sshll.u32 %s88_s0, 4  ;;  %s12_s11 = sshll.u32 %s89_s1, 4  ;;  %s11_s8 = int_to_ptr.hbm [resolvable:$true] %s10_s8  ;;  %s13_s11 = int_to_ptr.hbm [resolvable:$true] %s12_s11 }
   0x2   :  { %s17_s14 = scalar_lea.hbm %s88_s0, 128  ;;  %s63_s17 = smov 0  }
   0x3   :  { %16 = dma.general %s11_s8, 2048, %s13_s11, %s61_s15, %s62_s16, [#allocation4], %s63_s17, 0  }
   0x4   :  { %s18_s20 = scalar_lea.hbm %s89_s1, 128  ;;  %s24_s21 = sshll.u32 %s17_s14, 4  ;;  %s25_s21 = int_to_ptr.hbm [resolvable:$true] %s24_s21 }
   0x5   :  { %s26_s22 = sshll.u32 %s18_s20, 4  ;;  %s64_s23 = smov [#allocation2 + $0x1]   ;;  %s27_s22 = int_to_ptr.hbm [resolvable:$true] %s26_s22 }
   0x6   :  { %s65_s24 = smov [#allocation5]  }
   0x7   :  { %30 = dma.general %s25_s21, 2048, %s27_s22, %s64_s23, %s65_s24, [#allocation6], %s63_s17, 0  }
   0x8   :  { %57 = dma.done.wait [#allocation2], 2048 }
   0x9   :  { %58 = vsyncadd [#allocation2], 4294965248 }
   0xa   :  { %59 = dma.done.wait [#allocation2 + $0x1], 2048 }
   0xb   :  { %60 = vsyncadd [#allocation2 + $0x1], 4294965248 }
   0xc   :  { %37 = vsyncmov [#allocation2] }
   0xf   :  { %s38_s0 = vpop.sfrf %37 }
  0x10   :  { %p50_p0 = scmp.ne.s32.totalorder %s38_s0, 0 }
  0x12   :  { %42 = shalt.err (%p50_p0)  }
  0x13   :  { %44 = vsyncmov [#allocation2 + $0x1] }
  0x16   :  { %s45_s25 = vpop.sfrf %44 }
  0x17   :  { %p51_p1 = scmp.ne.s32.totalorder %s45_s25, 0 }
  0x19   :  { %49 = shalt.err (%p51_p1)  }

</bundles_post_ra>
